<compile_context>
chip_gen: v6e
topology: v6e:2x2x1
jax: 0.10.0
libtpu: 0.0.40
codegen_flags: <defaults>
</compile_context>

<pallas_src>
import functools

import jax
import jax.numpy as jnp
from jax.experimental import pallas as pl
from jax.experimental.pallas import tpu as pltpu

HIDDEN = 256
LANE = 128
MIN_TILE = 16  # bf16 packs 16 rows per (sublane-packed) vreg tile


def _round_up(n, m):
    return (n + m - 1) // m * m


def _bf16_elementwise_ok():
    """v6e/v7x VPUs handle bf16 natively; v5e and earlier do not."""
    try:
        kind = jax.devices()[0].device_kind.lower()
    except Exception:
        return False
    return any(tag in kind for tag in ("v6", "v7", "7x"))


_BF16_ELEMENTWISE = _bf16_elementwise_ok()


def actor_kernel(x_ref, w1_ref, b1_ref, w2_ref, b2_ref, w3_ref, b3_ref, o_ref,
                 *, bf16_elementwise):
    # fc1: bf16 operands -> f32 MXU accumulation.
    x = x_ref[...].astype(jnp.bfloat16)
    h = jnp.dot(x, w1_ref[...], preferred_element_type=jnp.float32)
    if bf16_elementwise:
        # v6e/v7x: cast the f32 accumulator once, do bias+relu in bf16.
        h = jnp.maximum(h.astype(jnp.bfloat16) + b1_ref[...].astype(jnp.bfloat16), 0)
        h = jnp.dot(h, w2_ref[...], preferred_element_type=jnp.float32)
        h = jnp.maximum(h.astype(jnp.bfloat16) + b2_ref[...].astype(jnp.bfloat16), 0)
        mu = jnp.dot(h, w3_ref[...], preferred_element_type=jnp.float32)
    else:
        # v5e: no bf16 VPU -> keep elementwise in f32, cast only for the MXU.
        h = jnp.maximum(h + b1_ref[...], 0.0)
        h = jnp.dot(h.astype(jnp.bfloat16), w2_ref[...],
                    preferred_element_type=jnp.float32)
        h = jnp.maximum(h + b2_ref[...], 0.0)
        mu = jnp.dot(h.astype(jnp.bfloat16), w3_ref[...],
                     preferred_element_type=jnp.float32)
    # Final bias + tanh in f32 for accuracy; store in the requested dtype.
    o_ref[...] = jnp.tanh(mu + b3_ref[...]).astype(o_ref.dtype)


def prepare_params(params):
    """One-time (outside jit) weight prep: bf16 casts + lane-pad the last layer."""
    w1, b1, w2, b2, w3, b3 = params
    act_dim = w3.shape[1]
    out_pad = _round_up(act_dim, LANE)
    if out_pad != act_dim:
        w3 = jnp.zeros((w3.shape[0], out_pad), w3.dtype).at[:, :act_dim].set(w3)
        b3 = jnp.zeros((1, out_pad), b3.dtype).at[:, :act_dim].set(b3)
    return (w1.astype(jnp.bfloat16), b1.astype(jnp.float32),
            w2.astype(jnp.bfloat16), b2.astype(jnp.float32),
            w3.astype(jnp.bfloat16), b3.astype(jnp.float32))


@functools.partial(
    jax.jit,
    static_argnames=("act_dim", "block_batch", "out_dtype", "return_padded"))
def actor_forward(x, prepared, act_dim, block_batch=512,
                  out_dtype=jnp.float32, return_padded=False):
    w1, b1, w2, b2, w3, b3 = prepared
    batch, obs_dim = x.shape
    hidden = w1.shape[1]
    out_pad = w3.shape[1]

    # Sanitize the batch tile to the bf16 packed-sublane granule.
    block_batch = max(MIN_TILE, _round_up(block_batch, MIN_TILE))
    batch16 = _round_up(batch, MIN_TILE)
    if batch16 <= 2 * MIN_TILE:
        tb = batch16                       # tiny/latency-bound: single step
    else:
        # Force >= 2 grid steps so the "parallel" batch axis shards across
        # v7x's two TensorCores; cap at block_batch for VMEM/bounded tiles.
        tb = min(block_batch, _round_up(pl.cdiv(batch16, 2), MIN_TILE))
    padded_batch = _round_up(batch16, tb)
    grid = (padded_batch // tb,)

    xp = x
    if padded_batch != batch:
        xp = jnp.zeros((padded_batch, obs_dim), x.dtype).at[:batch].set(x)

    flops = 2 * padded_batch * (obs_dim * hidden + hidden * hidden
                                + hidden * out_pad)
    bytes_accessed = (xp.size * xp.dtype.itemsize
                      + (w1.size + w2.size + w3.size) * 2
                      + (b1.size + b2.size + b3.size) * 4
                      + padded_batch * out_pad * jnp.dtype(out_dtype).itemsize)

    def pinned(shape):
        # Constant block index -> operand stays VMEM-resident across grid steps.
        return pl.BlockSpec(shape, lambda i: (0, 0))

    out = pl.pallas_call(
        functools.partial(actor_kernel, bf16_elementwise=_BF16_ELEMENTWISE),
        out_shape=jax.ShapeDtypeStruct((padded_batch, out_pad), out_dtype),
        grid=grid,
        in_specs=[
            pl.BlockSpec((tb, obs_dim), lambda i: (i, 0)),   # x tile (f32)
            pinned((obs_dim, hidden)),                       # w1 (bf16)
            pinned((1, hidden)),                             # b1 (f32)
            pinned((hidden, hidden)),                        # w2 (bf16)
            pinned((1, hidden)),                             # b2 (f32)
            pinned((hidden, out_pad)),                       # w3 (bf16, padded)
            pinned((1, out_pad)),                            # b3 (f32, padded)
        ],
        out_specs=pl.BlockSpec((tb, out_pad), lambda i: (i, 0)),
        compiler_params=pltpu.CompilerParams(
            dimension_semantics=("parallel",)),
        cost_estimate=pl.CostEstimate(
            flops=flops,
            transcendentals=padded_batch * out_pad,
            bytes_accessed=bytes_accessed),
    )(xp, w1, b1, w2, b2, w3, b3)

    if return_padded:
        # Padded rows / lanes contain tanh(bias)/zeros garbage; callers of the
        # padded slab must slice or mask [:batch, :act_dim] themselves.
        return out
    return out[:batch, :act_dim]


def init_params(key, obs_dim, act_dim):
    """Deterministic init mimicking nn.Linear's U(-1/sqrt(fan_in), 1/sqrt(fan_in))."""
    def linear(k, fan_in, fan_out):
        kw, kb = jax.random.split(k)
        bound = 1.0 / jnp.sqrt(fan_in)
        w = jax.random.uniform(kw, (fan_in, fan_out), jnp.float32, -bound, bound)
        b = jax.random.uniform(kb, (1, fan_out), jnp.float32, -bound, bound)
        return w, b

    k1, k2, k3 = jax.random.split(key, 3)
    w1, b1 = linear(k1, obs_dim, HIDDEN)
    w2, b2 = linear(k2, HIDDEN, HIDDEN)
    w3, b3 = linear(k3, HIDDEN, act_dim)
    return (w1, b1, w2, b2, w3, b3)


def reference_forward(x, params, bf16_elementwise=False):
    """Pure-JAX reference mirroring the kernel's bf16/f32 numerics recipe."""
    w1, b1, w2, b2, w3, b3 = params
    bf = jnp.bfloat16
    h = jnp.dot(x.astype(bf), w1.astype(bf), preferred_element_type=jnp.float32)
    if bf16_elementwise:
        h = jnp.maximum(h.astype(bf) + b1.astype(bf), 0)
        h = jnp.dot(h, w2.astype(bf), preferred_element_type=jnp.float32)
        h = jnp.maximum(h.astype(bf) + b2.astype(bf), 0)
        mu = jnp.dot(h, w3.astype(bf), preferred_element_type=jnp.float32)
    else:
        h = jnp.maximum(h + b1, 0.0)
        h = jnp.dot(h.astype(bf), w2.astype(bf), preferred_element_type=jnp.float32)
        h = jnp.maximum(h + b2, 0.0)
        mu = jnp.dot(h.astype(bf), w3.astype(bf), preferred_element_type=jnp.float32)
    return jnp.tanh(mu + b3)


def reference_forward_f32(x, params):
    """Full-f32 reference matching the original PyTorch Actor semantics."""
    w1, b1, w2, b2, w3, b3 = params
    h = jnp.maximum(x @ w1 + b1, 0.0)
    h = jnp.maximum(h @ w2 + b2, 0.0)
    return jnp.tanh(h @ w3 + b3)


if __name__ == "__main__":
    key = jax.random.PRNGKey(0)
    k_x, k_p = jax.random.split(key)

    obs_dim, act_dim = 16, 8
    params = init_params(k_p, obs_dim, act_dim)
    prepared = prepare_params(params)   # one-time bf16 cast + lane-pad

    # 1) Tiny-batch / single-tile path (RL rollout shape).
    batch = 8
    x = jax.random.normal(k_x, (batch, obs_dim), jnp.float32)
    out = jax.block_until_ready(actor_forward(x, prepared, act_dim=act_dim))
    ref = reference_forward(x, params, bf16_elementwise=_BF16_ELEMENTWISE)
    ref_f32 = reference_forward_f32(x, params)
    assert out.shape == (batch, act_dim)
    assert jnp.allclose(out, ref, atol=2e-3, rtol=2e-3)
    # Loose sanity check against full-f32 PyTorch semantics (bf16 contract).
    assert jnp.allclose(out, ref_f32, atol=5e-2, rtol=5e-2)

    # 2) Training-sized batch: >=2 grid steps (shards v7x's two TCs), tb%16==0.
    batch2 = 200
    x2 = jax.random.normal(k_x, (batch2, obs_dim), jnp.float32)
    out2 = jax.block_until_ready(actor_forward(x2, prepared, act_dim=act_dim))
    ref2 = reference_forward(x2, params, bf16_elementwise=_BF16_ELEMENTWISE)
    assert out2.shape == (batch2, act_dim)
    assert jnp.allclose(out2, ref2, atol=2e-3, rtol=2e-3)

    # 3) Non-multiple block_batch (sanitized to 64) + bf16 output store path.
    out3 = jax.block_until_ready(
        actor_forward(x2, prepared, act_dim=act_dim, block_batch=50,
                      out_dtype=jnp.bfloat16))
    assert out3.shape == (batch2, act_dim)
    assert jnp.allclose(out3.astype(jnp.float32), ref2, atol=1e-2, rtol=1e-2)

    print("KERNEL_OK")
</pallas_src>

<mosaic_0001>
module attributes {stable_mosaic.version = 11 : i64} {
  func.func @actor_kernel(%arg0: i32, %arg1: memref<16x16xf32, #tpu.memory_space<vmem>>, %arg2: memref<16x256xbf16, #tpu.memory_space<vmem>>, %arg3: memref<1x256xf32, #tpu.memory_space<vmem>>, %arg4: memref<256x256xbf16, #tpu.memory_space<vmem>>, %arg5: memref<1x256xf32, #tpu.memory_space<vmem>>, %arg6: memref<256x128xbf16, #tpu.memory_space<vmem>>, %arg7: memref<1x128xf32, #tpu.memory_space<vmem>>, %arg8: memref<16x128xf32, #tpu.memory_space<vmem>>) attributes {dimension_semantics = [#tpu.dimension_semantics<parallel>], iteration_bounds = array<i64: 1>, scalar_prefetch = 0 : i64, scratch_operands = 0 : i64, tpu.core_type = #tpu.core_type<tc>, window_params = [{transform_indices = @transform_0, window_bounds = array<i64: 16, 16>}, {pipeline_mode = #tpu.pipeline_mode<synchronous>, transform_indices = @transform_1, window_bounds = array<i64: 16, 256>}, {pipeline_mode = #tpu.pipeline_mode<synchronous>, transform_indices = @transform_2, window_bounds = array<i64: 1, 256>}, {pipeline_mode = #tpu.pipeline_mode<synchronous>, transform_indices = @transform_3, window_bounds = array<i64: 256, 256>}, {pipeline_mode = #tpu.pipeline_mode<synchronous>, transform_indices = @transform_4, window_bounds = array<i64: 1, 256>}, {pipeline_mode = #tpu.pipeline_mode<synchronous>, transform_indices = @transform_5, window_bounds = array<i64: 256, 128>}, {pipeline_mode = #tpu.pipeline_mode<synchronous>, transform_indices = @transform_6, window_bounds = array<i64: 1, 128>}, {transform_indices = @transform_7, window_bounds = array<i64: 16, 128>}]} {
    %c0 = arith.constant 0 : index
    %c0_0 = arith.constant 0 : index
    %0 = vector.load %arg1[%c0, %c0_0] : memref<16x16xf32, #tpu.memory_space<vmem>>, vector<16x16xf32>
    %1 = arith.truncf %0 : vector<16x16xf32> to vector<16x16xbf16>
    %c0_1 = arith.constant 0 : index
    %c0_2 = arith.constant 0 : index
    %2 = vector.load %arg2[%c0_1, %c0_2] : memref<16x256xbf16, #tpu.memory_space<vmem>>, vector<16x256xbf16>
    %cst = arith.constant dense<0.000000e+00> : vector<16x256xf32>
    %3 = tpu.matmul %1, %2, %cst {dimension_numbers = #tpu.dot_dimension_numbers<[1], [0], [0], [1], [0, 0, 1, 1], [], []>} : vector<16x16xbf16>, vector<16x256xbf16>, vector<16x256xf32> -> vector<16x256xf32>
    %c0_3 = arith.constant 0 : index
    %c0_4 = arith.constant 0 : index
    %4 = vector.load %arg3[%c0_3, %c0_4] : memref<1x256xf32, #tpu.memory_space<vmem>>, vector<1x256xf32>
    %5 = vector.broadcast %4 : vector<1x256xf32> to vector<16x256xf32>
    %6 = arith.addf %3, %5 : vector<16x256xf32>
    %cst_5 = arith.constant 0.000000e+00 : f32
    %7 = vector.broadcast %cst_5 : f32 to vector<16x256xf32>
    %8 = arith.maximumf %6, %7 : vector<16x256xf32>
    %9 = arith.truncf %8 : vector<16x256xf32> to vector<16x256xbf16>
    %c0_6 = arith.constant 0 : index
    %c0_7 = arith.constant 0 : index
    %10 = vector.load %arg4[%c0_6, %c0_7] : memref<256x256xbf16, #tpu.memory_space<vmem>>, vector<256x256xbf16>
    %cst_8 = arith.constant dense<0.000000e+00> : vector<16x256xf32>
    %11 = tpu.matmul %9, %10, %cst_8 {dimension_numbers = #tpu.dot_dimension_numbers<[1], [0], [0], [1], [0, 0, 1, 1], [], []>} : vector<16x256xbf16>, vector<256x256xbf16>, vector<16x256xf32> -> vector<16x256xf32>
    %c0_9 = arith.constant 0 : index
    %c0_10 = arith.constant 0 : index
    %12 = vector.load %arg5[%c0_9, %c0_10] : memref<1x256xf32, #tpu.memory_space<vmem>>, vector<1x256xf32>
    %13 = vector.broadcast %12 : vector<1x256xf32> to vector<16x256xf32>
    %14 = arith.addf %11, %13 : vector<16x256xf32>
    %cst_11 = arith.constant 0.000000e+00 : f32
    %15 = vector.broadcast %cst_11 : f32 to vector<16x256xf32>
    %16 = arith.maximumf %14, %15 : vector<16x256xf32>
    %17 = arith.truncf %16 : vector<16x256xf32> to vector<16x256xbf16>
    %c0_12 = arith.constant 0 : index
    %c0_13 = arith.constant 0 : index
    %18 = vector.load %arg6[%c0_12, %c0_13] : memref<256x128xbf16, #tpu.memory_space<vmem>>, vector<256x128xbf16>
    %cst_14 = arith.constant dense<0.000000e+00> : vector<16x128xf32>
    %19 = tpu.matmul %17, %18, %cst_14 {dimension_numbers = #tpu.dot_dimension_numbers<[1], [0], [0], [1], [0, 0, 1, 1], [], []>} : vector<16x256xbf16>, vector<256x128xbf16>, vector<16x128xf32> -> vector<16x128xf32>
    %c0_15 = arith.constant 0 : index
    %c0_16 = arith.constant 0 : index
    %20 = vector.load %arg7[%c0_15, %c0_16] : memref<1x128xf32, #tpu.memory_space<vmem>>, vector<1x128xf32>
    %21 = vector.broadcast %20 : vector<1x128xf32> to vector<16x128xf32>
    %22 = arith.addf %19, %21 : vector<16x128xf32>
    %23 = math.tanh %22 : vector<16x128xf32>
    %c0_17 = arith.constant 0 : index
    %c0_18 = arith.constant 0 : index
    %24 = vector.load %arg8[%c0_17, %c0_18] : memref<16x128xf32, #tpu.memory_space<vmem>>, vector<16x128xf32>
    tpu.vector_store %arg8[%c0_17, %c0_18], %23 {strides = array<i32>} : memref<16x128xf32, #tpu.memory_space<vmem>>, vector<16x128xf32>,
    return
  }
  func.func @transform_0(%arg0: i32) -> (i32, i32) {
    %c0_i32 = arith.constant 0 : i32
    %c0_i32_0 = arith.constant 0 : i32
    return %arg0, %c0_i32 : i32, i32
  }
  func.func @transform_1(%arg0: i32) -> (i32, i32) {
    %c0_i32 = arith.constant 0 : i32
    %c0_i32_0 = arith.constant 0 : i32
    %c0_i32_1 = arith.constant 0 : i32
    return %c0_i32, %c0_i32_0 : i32, i32
  }
  func.func @transform_2(%arg0: i32) -> (i32, i32) {
    %c0_i32 = arith.constant 0 : i32
    %c0_i32_0 = arith.constant 0 : i32
    %c0_i32_1 = arith.constant 0 : i32
    return %c0_i32, %c0_i32_0 : i32, i32
  }
  func.func @transform_3(%arg0: i32) -> (i32, i32) {
    %c0_i32 = arith.constant 0 : i32
    %c0_i32_0 = arith.constant 0 : i32
    %c0_i32_1 = arith.constant 0 : i32
    return %c0_i32, %c0_i32_0 : i32, i32
  }
  func.func @transform_4(%arg0: i32) -> (i32, i32) {
    %c0_i32 = arith.constant 0 : i32
    %c0_i32_0 = arith.constant 0 : i32
    %c0_i32_1 = arith.constant 0 : i32
    return %c0_i32, %c0_i32_0 : i32, i32
  }
  func.func @transform_5(%arg0: i32) -> (i32, i32) {
    %c0_i32 = arith.constant 0 : i32
    %c0_i32_0 = arith.constant 0 : i32
    %c0_i32_1 = arith.constant 0 : i32
    return %c0_i32, %c0_i32_0 : i32, i32
  }
  func.func @transform_6(%arg0: i32) -> (i32, i32) {
    %c0_i32 = arith.constant 0 : i32
    %c0_i32_0 = arith.constant 0 : i32
    %c0_i32_1 = arith.constant 0 : i32
    return %c0_i32, %c0_i32_0 : i32, i32
  }
  func.func @transform_7(%arg0: i32) -> (i32, i32) {
    %c0_i32 = arith.constant 0 : i32
    %c0_i32_0 = arith.constant 0 : i32
    return %arg0, %c0_i32 : i32, i32
  }
}

</mosaic_0001>

<bundles_post_ra>
// kernel: actor_forward.1
= control target key start
LH: loop header
LB: loop body
LE: loop exit
PB: predicated region body
PF: predicated region fallthrough
CT: control target
= control target key end

     0   :  { %12 = vsyncpa [#allocation3], 0  ;;  %s850_s0 = inlined_call_operand.vmem [shape: f32[16,16], index: 0, kind: input, shape index: {}]   ;;  %s851_s1 = inlined_call_operand.vmem [shape: bf16[16,256], index: 1, kind: input, shape index: {}]   ;;  %s852_s2 = inlined_call_operand.vmem [shape: f32[1,256], index: 2, kind: input, shape index: {}]   ;;  %s853_s3 = inlined_call_operand.hbm [shape: bf16[256,256], index: 3, kind: input, shape index: {}]   ;;  %s854_s4 = inlined_call_operand.vmem [shape: f32[1,256], index: 4, kind: input, shape index: {}]   ;;  %s855_s5 = inlined_call_operand.hbm [shape: bf16[256,128], index: 5, kind: input, shape index: {}]   ;;  %s856_s6 = inlined_call_operand.vmem [shape: f32[1,128], index: 6, kind: input, shape index: {}]   ;;  %s857_s7 = inlined_call_operand.vmem [shape: f32[16,128], index: 7, kind: output, shape index: {}]  }
   0x1   :  { %13 = vsyncpa [#allocation5], 0  ;;  %s770_s24 = smov [#allocation2]  }
   0x2   :  { %s25_s25 = sshll.u32 %s770_s24, 4  ;;  %s26_s25 = int_to_ptr.vmem [resolvable:$true] %s25_s25 }
   0x3   :  { %s734_s26 = scalar_lea.vmem %s26_s25, 4096  ;;  %p739_p1 = scmp.lt.s32.totalorder %s26_s25, %s26_s25 }
   0x4   :  { %p735_p0 = scmp.ne.s32.totalorder %s26_s25, %s734_s26  ;;  %p740_p2 = scmp.lt.s32.totalorder %s734_s26, %s734_s26 }
   0x6   :  { %p741_p3 = por %p740_p2, %p739_p1 }
   0x8   :  { %p742_p4 = pnand %p741_p3, %p735_p0 }
   0xa   :  { %745 = shalt.err (!%p742_p4)
}
   0xb   :  { %s771_s27 = smov 128   ;;  %s772_s28 = smov 8  }
   0xc   :  { %31 = dma.hbm_to_vmem [thread:$0]  %s853_s3, 4096, %s26_s25, [#allocation3], %s771_s27, %s771_s27, %s772_s28  }
   0xd   :  { %s773_s8 = smov [#allocation4]  }
   0xe   :  { %s39_s9 = sshll.u32 %s773_s8, 4  ;;  %s40_s9 = int_to_ptr.vmem [resolvable:$true] %s39_s9 }
   0xf   :  { %s754_s10 = scalar_lea.vmem %s40_s9, 2048  ;;  %p759_p6 = scmp.lt.s32.totalorder %s40_s9, %s40_s9 }
  0x10   :  { %p755_p5 = scmp.ne.s32.totalorder %s40_s9, %s754_s10  ;;  %p760_p7 = scmp.lt.s32.totalorder %s754_s10, %s754_s10 }
  0x12   :  { %p761_p8 = por %p760_p7, %p759_p6 }
  0x14   :  { %p762_p9 = pnand %p761_p8, %p755_p5 }
  0x16   :  { %765 = shalt.err (!%p762_p9)
}
  0x17   :  { %s774_s11 = smov 64   ;;  %s775_s12 = smov 4  }
  0x18   :  { %45 = dma.hbm_to_vmem [thread:$0]  %s855_s5, 2048, %s40_s9, [#allocation5], %s774_s11, %s774_s11, %s775_s12  }
  0x19   :  { %766 = dma.done.wait [#allocation3], 4096  }
  0x1a   :  { %767 = vsyncadd [#allocation3], 4294963200 }
  0x1b   :  { %768 = dma.done.wait [#allocation5], 2048  }
  0x1c   :  { %769 = vsyncadd [#allocation5], 4294965248  ;;  %v776_v0 = vmov 0   ;;  %v655_v1 = vld [vmem:[%s851_s1 + $0x4] ss:$8 sps:$4 sm:$0xff]   ;;  %vm82_vm0 = vcmask 130048   ;;  %v62_v48 = vlaneseq }
  0x1d   :  { %118 = vmatprep.mubr.bf16.mxu0 %v776_v0  ;;  %v657_v2 = vld [vmem:[%s851_s1] ss:$8 sps:$4 sm:$0xff]   ;;  %100 = vmatprep.subr.bf16.mxu0 %v655_v1  ;;  %v658_v6 = vld [vmem:[#allocation2 + $0x74] ss:$8 sps:$4 sm:$0xff]   ;;  %v660_v7 = vld [vmem:[#allocation2 + $0x70] ss:$8 sps:$4 sm:$0xff]  }
  0x1e   :  { %v55_v3 = vld [vmem:[%s850_s0] sm:$0xff]  ;;  %v56_v4 = vld [vmem:[%s850_s0 + $0x8] sm:$0xff]  ;;  %101 = vmatpush1.bf16.msra.mxu0 %v657_v2  ;;  %339 = vmatprep.subr.bf16.mxu1 %v658_v6  ;;  %v664_v10 = vld [vmem:[#allocation2 + $0x54] ss:$8 sps:$4 sm:$0xff]   ;;  %v63_v49 = vshrl.u32 %v62_v48, 7 }
  0x1f   :  { %v57_v5 = vpack.c.bf16 %v56_v4, %v55_v3  ;;  %v661_v8 = vld [vmem:[#allocation2 + $0x64] ss:$8 sps:$4 sm:$0xff]   ;;  %340 = vmatpush1.bf16.msra.mxu1 %v660_v7  ;;  %v663_v9 = vld [vmem:[#allocation2 + $0x60] ss:$8 sps:$4 sm:$0xff]   ;;  %v666_v11 = vld [vmem:[#allocation2 + $0x50] ss:$8 sps:$4 sm:$0xff]  }
  0x20   :  { %341 = vmatprep.subr.bf16.mxu1 %v661_v8  ;;  %v667_v12 = vld [vmem:[#allocation2 + $0x44] ss:$8 sps:$4 sm:$0xff]   ;;  %v669_v13 = vld [vmem:[#allocation2 + $0x40] ss:$8 sps:$4 sm:$0xff]   ;;  %v670_v14 = vld [vmem:[#allocation2 + $0x34] ss:$8 sps:$4 sm:$0xff]  }
  0x21   :  { %576 = vmatmul.mubr.msk.bf16.vlgmr.msra.gmra.mxu0 %vm82_vm0, %v57_v5  ;;  %v672_v15 = vld [vmem:[#allocation2 + $0x30] ss:$8 sps:$4 sm:$0xff]   ;;  %v673_v16 = vld [vmem:[#allocation2 + $0x24] ss:$8 sps:$4 sm:$0xff]   ;;  %v675_v17 = vld [vmem:[#allocation2 + $0x20] ss:$8 sps:$4 sm:$0xff]  }
  0x22   :  { %v676_v18 = vld [vmem:[#allocation2 + $0x14] ss:$8 sps:$4 sm:$0xff]   ;;  %v678_v19 = vld [vmem:[#allocation2 + $0x10] ss:$8 sps:$4 sm:$0xff]   ;;  %v679_v20 = vld [vmem:[#allocation2 + $0x4] ss:$8 sps:$4 sm:$0xff]  }
  0x23   :  { %342 = vmatpush1.bf16.msra.mxu1 %v663_v9  ;;  %v681_v21 = vld [vmem:[#allocation2] ss:$8 sps:$4 sm:$0xff]   ;;  %v682_v22 = vld [vmem:[#allocation2 + $0xf4] ss:$8 sps:$4 sm:$0xff]   ;;  %v684_v23 = vld [vmem:[#allocation2 + $0xf0] ss:$8 sps:$4 sm:$0xff]  }
  0x24   :  { %343 = vmatprep.subr.bf16.mxu1 %v664_v10  ;;  %v685_v24 = vld [vmem:[#allocation2 + $0xe4] ss:$8 sps:$4 sm:$0xff]   ;;  %v687_v25 = vld [vmem:[#allocation2 + $0xe0] ss:$8 sps:$4 sm:$0xff]   ;;  %v688_v26 = vld [vmem:[#allocation2 + $0xd4] ss:$8 sps:$4 sm:$0xff]  }
  0x25   :  { %v690_v27 = vld [vmem:[#allocation2 + $0xd0] ss:$8 sps:$4 sm:$0xff]   ;;  %v691_v28 = vld [vmem:[#allocation2 + $0xc4] ss:$8 sps:$4 sm:$0xff]   ;;  %v693_v29 = vld [vmem:[#allocation2 + $0xc0] ss:$8 sps:$4 sm:$0xff]  }
  0x26   :  { %v694_v30 = vld [vmem:[#allocation2 + $0xb4] ss:$8 sps:$4 sm:$0xff]   ;;  %v696_v31 = vld [vmem:[#allocation2 + $0xb0] ss:$8 sps:$4 sm:$0xff]   ;;  %v697_v32 = vld [vmem:[#allocation2 + $0xa4] ss:$8 sps:$4 sm:$0xff]  }
  0x27   :  { %344 = vmatpush1.bf16.msra.mxu1 %v666_v11  ;;  %v699_v33 = vld [vmem:[#allocation2 + $0xa0] ss:$8 sps:$4 sm:$0xff]   ;;  %v700_v34 = vld [vmem:[#allocation2 + $0x94] ss:$8 sps:$4 sm:$0xff]   ;;  %v702_v35 = vld [vmem:[#allocation2 + $0x90] ss:$8 sps:$4 sm:$0xff]  }
  0x28   :  { %345 = vmatprep.subr.bf16.mxu1 %v667_v12  ;;  %v703_v36 = vld [vmem:[#allocation2 + $0x84] ss:$8 sps:$4 sm:$0xff]   ;;  %v705_v37 = vld [vmem:[#allocation2 + $0x80] ss:$8 sps:$4 sm:$0xff]   ;;  %v706_v38 = vld [vmem:[#allocation4 + $0x78] sm:$0xff]   ;;  %v68_v50 = vsub.s32 1, %v63_v49 }
  0x29   :  { %v707_v39 = vld [vmem:[#allocation4 + $0x38] sm:$0xff]   ;;  %v708_v40 = vld [vmem:[#allocation4 + $0x70] sm:$0xff]   ;;  %626 = vmatprep.subr.bf16.mxu0 %v706_v38  ;;  %v710_v42 = vld [vmem:[#allocation4 + $0x68] sm:$0xff]   ;;  %v64_v51 = vsub.s32 0, %v63_v49 }
  0x2a   :  { %627 = vmatpush3.bf16.msra.mxu0 %v707_v39  ;;  %v709_v41 = vld [vmem:[#allocation4 + $0x30] sm:$0xff]   ;;  %v711_v43 = vld [vmem:[#allocation4 + $0x28] sm:$0xff]   ;;  %v712_v44 = vld [vmem:[#allocation4 + $0x60] sm:$0xff]  }
  0x2b   :  { %346 = vmatpush1.bf16.msra.mxu1 %v669_v13  ;;  %628 = vmatprep.subr.bf16.mxu0 %v708_v40  ;;  %v713_v45 = vld [vmem:[#allocation4 + $0x20] sm:$0xff]   ;;  %v714_v46 = vld [vmem:[#allocation4 + $0x58] sm:$0xff]   ;;  %v716_v5 = vld [vmem:[#allocation4 + $0x50] sm:$0xff]  }
  0x2c   :  { %347 = vmatprep.subr.bf16.mxu1 %v670_v14  ;;  %v715_v47 = vld [vmem:[#allocation4 + $0x18] sm:$0xff]   ;;  %v60_v52 = vld [vmem:[%s852_s2] sm:$0x3]  ;;  %v717_v6 = vld [vmem:[#allocation4 + $0x10] sm:$0xff]  }
  0x2d   :  { %v69_v54 = vrot.slane %v60_v52, %v68_v50  ;;  %v65_v55 = vrot.slane %v60_v52, %v64_v51  ;;  %v718_v7 = vld [vmem:[#allocation4 + $0x48] sm:$0xff]   ;;  %v720_v9 = vld [vmem:[#allocation4 + $0x40] sm:$0xff]  }
  0x2e   :  { %629 = vmatpush3.bf16.msra.mxu0 %v709_v41  ;;  %v719_v8 = vld [vmem:[#allocation4 + $0x8] sm:$0xff]   ;;  %v721_v10 = vld [vmem:[#allocation4] sm:$0xff]  }
  0x2f   :  { %348 = vmatpush1.bf16.msra.mxu1 %v672_v15  ;;  %630 = vmatprep.subr.bf16.mxu0 %v710_v42  ;;  %v167_v11 = vld [vmem:[%s854_s4] sm:$0x3] }
  0x30   :  { %349 = vmatprep.subr.bf16.mxu1 %v673_v16  ;;  %v176_v13 = vrot.slane %v167_v11, %v68_v50  ;;  %v172_v14 = vrot.slane %v167_v11, %v64_v51 }
  0x32   :  { %631 = vmatpush3.bf16.msra.mxu0 %v711_v43 }
  0x33   :  { %350 = vmatpush1.bf16.msra.mxu1 %v675_v17  ;;  %632 = vmatprep.subr.bf16.mxu0 %v712_v44 }
  0x34   :  { %351 = vmatprep.subr.bf16.mxu1 %v676_v18 }
  0x36   :  { %633 = vmatpush3.bf16.msra.mxu0 %v713_v45 }
  0x37   :  { %352 = vmatpush1.bf16.msra.mxu1 %v678_v19  ;;  %634 = vmatprep.subr.bf16.mxu0 %v714_v46 }
  0x38   :  { %353 = vmatprep.subr.bf16.mxu1 %v679_v20 }
  0x3a   :  { %635 = vmatpush3.bf16.msra.mxu0 %v715_v47 }
  0x3b   :  { %354 = vmatpush1.bf16.msra.mxu1 %v681_v21  ;;  %636 = vmatprep.subr.bf16.mxu0 %v716_v5 }
  0x3c   :  { %355 = vmatprep.subr.bf16.mxu1 %v682_v22 }
  0x3e   :  { %637 = vmatpush3.bf16.msra.mxu0 %v717_v6 }
  0x3f   :  { %356 = vmatpush2.bf16.msra.mxu1 %v684_v23  ;;  %638 = vmatprep.subr.bf16.mxu0 %v718_v7 }
  0x40   :  { %357 = vmatprep.subr.bf16.mxu1 %v685_v24 }
  0x42   :  { %639 = vmatpush3.bf16.msra.mxu0 %v719_v8 }
  0x43   :  { %358 = vmatpush2.bf16.msra.mxu1 %v687_v25  ;;  %640 = vmatprep.subr.bf16.mxu0 %v720_v9 }
  0x44   :  { %359 = vmatprep.subr.bf16.mxu1 %v688_v26 }
  0x46   :  { %641 = vmatpush3.bf16.msra.mxu0 %v721_v10 }
  0x47   :  { %360 = vmatpush2.bf16.msra.mxu1 %v690_v27 }
  0x48   :  { %361 = vmatprep.subr.bf16.mxu1 %v691_v28 }
  0x4b   :  { %362 = vmatpush2.bf16.msra.mxu1 %v693_v29  ;;  %v609_v29 = vld [vmem:[%s856_s6] ss:$0 sm:$0xff] }
  0x4c   :  { %363 = vmatprep.subr.bf16.mxu1 %v694_v30 }
  0x4f   :  { %364 = vmatpush2.bf16.msra.mxu1 %v696_v31 }
  0x50   :  { %365 = vmatprep.subr.bf16.mxu1 %v697_v32 }
  0x53   :  { %366 = vmatpush2.bf16.msra.mxu1 %v699_v33 }
  0x54   :  { %367 = vmatprep.subr.bf16.mxu1 %v700_v34 }
  0x57   :  { %368 = vmatpush2.bf16.msra.mxu1 %v702_v35 }
  0x58   :  { %369 = vmatprep.subr.bf16.mxu1 %v703_v36 }
  0x5b   :  { %370 = vmatpush2.bf16.msra.mxu1 %v705_v37 }
  0xe1   :  { %v120_v53 = vpop.f32.mrf.mxu0 }
  0xe2   :  { %v121_v60 = vadd.f32 %v120_v53, %v65_v55 }
  0xe3   :  { %v122_v56 = vpop.f32.mrf.mxu0 }
  0xe4   :  { %v123_v58 = vadd.f32 %v122_v56, %v69_v54  ;;  %v129_v2 = vmax.f32 %v121_v60, 0.0 }
  0xe5   :  { %v124_v57 = vpop.f32.mrf.mxu0 }
  0xe6   :  { %v125_v59 = vadd.f32 %v124_v57, %v65_v55  ;;  %v130_v0 = vmax.f32 %v123_v58, 0.0 }
  0xe7   :  { %v126_v61 = vpop.f32.mrf.mxu0 }
  0xe8   :  { %v127_v62 = vadd.f32 %v126_v61, %v69_v54  ;;  %v131_v63 = vmax.f32 %v125_v59, 0.0 }
  0xea   :  { %v132_v1 = vmax.f32 %v127_v62, 0.0  ;;  %v133_v4 = vpack.c.bf16 %v131_v63, %v129_v2 }
  0xec   :  { %v134_v3 = vpack.c.bf16 %v132_v1, %v130_v0 }
  0xee   :  { %371 = vmatprep.mubr.bf16.mxu1 %v134_v3 }
  0xef   :  { %372 = vmatmul.mubr.bf16.vlgmr.msra.gmra.mxu1 %v133_v4 }
 0x1af   :  { %v373_v12 = vpop.f32.mrf.mxu1 }
 0x1b0   :  { %v374_v19 = vadd.f32 %v373_v12, %v172_v14 }
 0x1b1   :  { %v375_v15 = vpop.f32.mrf.mxu1 }
 0x1b2   :  { %v376_v17 = vadd.f32 %v375_v15, %v176_v13  ;;  %v382_v25 = vmax.f32 %v374_v19, 0.0 }
 0x1b3   :  { %v377_v16 = vpop.f32.mrf.mxu1 }
 0x1b4   :  { %v378_v18 = vadd.f32 %v377_v16, %v172_v14  ;;  %v383_v23 = vmax.f32 %v376_v17, 0.0 }
 0x1b5   :  { %v379_v20 = vpop.f32.mrf.mxu1 }
 0x1b6   :  { %v380_v21 = vadd.f32 %v379_v20, %v176_v13  ;;  %v384_v22 = vmax.f32 %v378_v18, 0.0 }
 0x1b8   :  { %v385_v24 = vmax.f32 %v380_v21, 0.0  ;;  %v386_v27 = vpack.c.bf16 %v384_v22, %v382_v25 }
 0x1ba   :  { %v387_v26 = vpack.c.bf16 %v385_v24, %v383_v23 }
 0x1bc   :  { %555 = vmatprep.mubr.bf16.mxu0 %v387_v26 }
 0x1bd   :  { %556 = vmatmul.mubr.bf16.vlgmr.msra.gmra.mxu0 %v386_v27 }
 0x27d   :  { %v642_v28 = vpop.f32.mrf.mxu0 }
 0x27f   :  { %v643_v30 = vpop.f32.mrf.mxu0 }
 0x280   :  { %v644_v31 = vadd.f32 %v643_v30, %v642_v28 }
 0x281   :  { %v645_v32 = vpop.f32.mrf.mxu0 }
 0x282   :  { %v558_v33 = vadd.f32 %v644_v31, %v609_v29 }
 0x283   :  { %v646_v34 = vpop.f32.mrf.mxu0 }
 0x284   :  { %722 = vtanh.f32 %v558_v33  ;;  %v647_v35 = vadd.f32 %v646_v34, %v645_v32 }
 0x286   :  { %v561_v36 = vadd.f32 %v647_v35, %v609_v29 }
 0x288   :  { %724 = vtanh.f32 %v561_v36 }
 0x291   :  { %v723_v37 = vpop.eup %722 }
 0x292   :  { %566 = vst [vmem:[%s857_s7] sm:$0xff] %v723_v37 }
 0x295   :  { %v725_v38 = vpop.eup %724 }
 0x296   :  { %567 = vst [vmem:[%s857_s7 + $0x8] sm:$0xff] %v725_v38 }
 0x297   :  { %572 = vsyncpa [#allocation3], 1 }
 0x298   :  { %573 = vsyncpa [#allocation5], 1 }

</bundles_post_ra>
